<compile_context>
chip_gen: v5e
topology: v5e:2x2
jax: 0.10.0
libtpu: 0.0.40
codegen_flags: <defaults>
</compile_context>

<pallas_src>
import functools

import jax
import jax.numpy as jnp
import numpy as np
from jax.experimental import pallas as pl
from jax.experimental.pallas import tpu as pltpu


def _asym_l2_tile_kernel(nonzero_cost, zero_cost,
                         pred_ref, mtarg_ref, pm_ref, targ_ref, tm_ref, o_ref):
    """One row-tile of the masked asymmetric L2 reduction.

    pred_ref : (T, D)  pred features
    mtarg_ref: (T, D)  targ features positionally paired with masked pred rows
    pm_ref   : (T, 1)  1.0 where pred coord is common, else 0.0 (0.0 in padding)
    targ_ref : (T, D)  targ features
    tm_ref   : (T, 1)  1.0 where targ coord is common, else 0.0
    o_ref    : (1,1,D) per-block lane partial sums
    """
    p = pred_ref[...].astype(jnp.float32)
    mt = mtarg_ref[...].astype(jnp.float32)
    pm = pm_ref[...].astype(jnp.float32)
    t = targ_ref[...].astype(jnp.float32)
    tm = tm_ref[...].astype(jnp.float32)

    # Fused pred path: pm==1 -> nonzero*(p-mt)^2 ; pm==0 -> zero*p^2
    d = p - pm * mt
    w = zero_cost + pm * (nonzero_cost - zero_cost)
    contrib = w * d * d + nonzero_cost * (1.0 - tm) * (t * t)

    # Sublane reduce only; cross-block + final scale happen in the JAX wrapper.
    o_ref[...] = jnp.sum(contrib, axis=0)[None, None, :]


def _round_up(x, m):
    return ((x + m - 1) // m) * m


def asymmetric_l2_loss_me(pred_C, pred_F, targ_C, targ_F,
                          nonzero_cost=2.0, zero_cost=1.0, batch_size=512,
                          row_tile=512):
    Np, D = pred_F.shape
    Nt, Dt = targ_F.shape
    assert D == Dt

    # ---- glue: duplicate-coordinate mask via lexsort (O(N log N)) -------------
    cat = jnp.concatenate([pred_C, targ_C], axis=0).astype(jnp.int32)
    M = cat.shape[0]
    order = jnp.lexsort(tuple(cat[:, c] for c in range(cat.shape[1] - 1, -1, -1)))
    sorted_cat = cat[order]
    adj_eq = jnp.all(sorted_cat[1:] == sorted_cat[:-1], axis=1)
    false1 = jnp.zeros((1,), dtype=bool)
    dup_sorted = jnp.concatenate([false1, adj_eq]) | jnp.concatenate([adj_eq, false1])
    mask = jnp.zeros((M,), dtype=bool).at[order].set(dup_sorted)   # counts > 1
    pm = mask[:Np]
    tm = mask[Np:]

    # ---- glue: reproduce PyTorch's *positional* pairing of the masked rows ----
    # i-th masked pred row is subtracted against the i-th masked targ row.
    rank_p = jnp.cumsum(pm.astype(jnp.int32)) - 1
    order_t = jnp.argsort(jnp.where(tm, jnp.arange(Nt), Nt + jnp.arange(Nt)))
    matched_idx = order_t[jnp.clip(rank_p, 0, Nt - 1)]
    matched_targ_F = targ_F[matched_idx]

    # ---- pad to a common tiled row count (zero feature rows contribute 0) -----
    n_rows = max(Np, Nt)
    tile = int(min(int(row_tile), _round_up(n_rows, 8)))
    tile = _round_up(max(tile, 8), 8)
    n_pad = _round_up(n_rows, tile)
    num_blocks = n_pad // tile

    def pad_rows(x):
        return jnp.pad(x, ((0, n_pad - x.shape[0]),) + ((0, 0),) * (x.ndim - 1))

    pred_p = pad_rows(pred_F)
    mtarg_p = pad_rows(matched_targ_F)
    targ_p = pad_rows(targ_F)
    pm_p = pad_rows(pm.astype(jnp.float32)[:, None])
    tm_p = pad_rows(tm.astype(jnp.float32)[:, None])

    feat_spec = pl.BlockSpec((tile, D), lambda i: (i, 0))
    mask_spec = pl.BlockSpec((tile, 1), lambda i: (i, 0))

    itemsize = int(jnp.dtype(pred_p.dtype).itemsize)
    flops = int(10 * n_pad * D)
    bytes_accessed = int(3 * n_pad * D * itemsize + 2 * n_pad * 4 + num_blocks * D * 4)

    kernel = functools.partial(
        _asym_l2_tile_kernel, float(nonzero_cost), float(zero_cost))

    partials = pl.pallas_call(
        kernel,
        out_shape=jax.ShapeDtypeStruct((num_blocks, 1, D), jnp.float32),
        grid=(num_blocks,),
        in_specs=[feat_spec, feat_spec, mask_spec, feat_spec, mask_spec],
        out_specs=pl.BlockSpec((1, 1, D), lambda i: (i, 0, 0)),
        compiler_params=pltpu.CompilerParams(
            dimension_semantics=("parallel",),
            vmem_limit_bytes=32 * 1024 * 1024),
        cost_estimate=pl.CostEstimate(
            flops=flops, transcendentals=0, bytes_accessed=bytes_accessed),
    )(pred_p, mtarg_p, pm_p, targ_p, tm_p)

    inv_denom = 1.0 / float(batch_size * 128 * 256)
    return jnp.sum(partials) * inv_denom


def _reference_numpy(pred_C, pred_F, targ_C, targ_F,
                     nonzero_cost=2.0, zero_cost=1.0, batch_size=512):
    """Direct numpy transcription of the PyTorch forward."""
    cat = np.concatenate([pred_C, targ_C], axis=0)
    _, idx, counts = np.unique(cat, axis=0, return_inverse=True, return_counts=True)
    mask = (counts > 1)[idx]
    pm = mask[:pred_C.shape[0]]
    tm = mask[pred_C.shape[0]:]
    cp, ct = pred_F[pm], targ_F[tm]
    up, ut = pred_F[~pm], targ_F[~tm]
    common = np.sum(nonzero_cost * (cp - ct) ** 2)
    only_p = np.sum(zero_cost * up ** 2)
    only_t = np.sum(nonzero_cost * ut ** 2)
    return (common + only_p + only_t) / (batch_size * 128 * 256)


if __name__ == "__main__":
    key = jax.random.PRNGKey(0)
    k_pf, k_tf, k_pp, k_tp = jax.random.split(key, 4)

    Np, Nt, D = 64, 64, 128
    n_common = 40
    n_only = Np - n_common  # 24

    i_c = np.arange(n_common)
    i_o = np.arange(n_only)
    common_C = np.stack([np.zeros_like(i_c), i_c, i_c, i_c], axis=1).astype(np.int32)
    pred_only_C = np.stack([np.ones_like(i_o), i_o, i_o, i_o], axis=1).astype(np.int32)
    targ_only_C = np.stack([2 * np.ones_like(i_o), i_o, i_o, i_o], axis=1).astype(np.int32)

    pred_C = np.concatenate([common_C, pred_only_C], axis=0)
    targ_C = np.concatenate([common_C, targ_only_C], axis=0)

    # shuffle row order independently (coords stay unique within each tensor)
    perm_p = np.asarray(jax.random.permutation(k_pp, Np))
    perm_t = np.asarray(jax.random.permutation(k_tp, Nt))
    pred_C = pred_C[perm_p]
    targ_C = targ_C[perm_t]

    pred_F = jax.random.normal(k_pf, (Np, D), dtype=jnp.float32)
    targ_F = jax.random.normal(k_tf, (Nt, D), dtype=jnp.float32)

    # row_tile=32 exercises the multi-block / parallel-grid path at this small size;
    # production default is 512-row tiles.
    loss = asymmetric_l2_loss_me(
        jnp.asarray(pred_C), pred_F, jnp.asarray(targ_C), targ_F,
        nonzero_cost=2.0, zero_cost=1.0, batch_size=512, row_tile=32)
    loss = jax.block_until_ready(loss)

    ref = _reference_numpy(pred_C, np.asarray(pred_F), targ_C, np.asarray(targ_F),
                           nonzero_cost=2.0, zero_cost=1.0, batch_size=512)

    np.testing.assert_allclose(np.asarray(loss), ref, rtol=1e-4, atol=1e-7)
    print("KERNEL_OK")
</pallas_src>

<mosaic_0001>
module attributes {stable_mosaic.version = 11 : i64} {
  func.func @_asym_l2_tile_kernel(%arg0: i32, %arg1: memref<32x128xf32, #tpu.memory_space<vmem>>, %arg2: memref<32x128xf32, #tpu.memory_space<vmem>>, %arg3: memref<32x1xf32, #tpu.memory_space<vmem>>, %arg4: memref<32x128xf32, #tpu.memory_space<vmem>>, %arg5: memref<32x1xf32, #tpu.memory_space<vmem>>, %arg6: memref<1x1x128xf32, #tpu.memory_space<vmem>>) attributes {dimension_semantics = [#tpu.dimension_semantics<parallel>], iteration_bounds = array<i64: 2>, scalar_prefetch = 0 : i64, scratch_operands = 0 : i64, tpu.core_type = #tpu.core_type<tc>, window_params = [{transform_indices = @transform_0, window_bounds = array<i64: 32, 128>}, {transform_indices = @transform_1, window_bounds = array<i64: 32, 128>}, {transform_indices = @transform_2, window_bounds = array<i64: 32, 1>}, {transform_indices = @transform_3, window_bounds = array<i64: 32, 128>}, {transform_indices = @transform_4, window_bounds = array<i64: 32, 1>}, {transform_indices = @transform_5, window_bounds = array<i64: 1, 1, 128>}]} {
    %c0 = arith.constant 0 : index
    %c0_0 = arith.constant 0 : index
    %0 = vector.load %arg1[%c0, %c0_0] : memref<32x128xf32, #tpu.memory_space<vmem>>, vector<32x128xf32>
    %c0_1 = arith.constant 0 : index
    %c0_2 = arith.constant 0 : index
    %1 = vector.load %arg2[%c0_1, %c0_2] : memref<32x128xf32, #tpu.memory_space<vmem>>, vector<32x128xf32>
    %c0_3 = arith.constant 0 : index
    %c0_4 = arith.constant 0 : index
    %2 = vector.load %arg3[%c0_3, %c0_4] : memref<32x1xf32, #tpu.memory_space<vmem>>, vector<32x1xf32>
    %c0_5 = arith.constant 0 : index
    %c0_6 = arith.constant 0 : index
    %3 = vector.load %arg4[%c0_5, %c0_6] : memref<32x128xf32, #tpu.memory_space<vmem>>, vector<32x128xf32>
    %c0_7 = arith.constant 0 : index
    %c0_8 = arith.constant 0 : index
    %4 = vector.load %arg5[%c0_7, %c0_8] : memref<32x1xf32, #tpu.memory_space<vmem>>, vector<32x1xf32>
    %5 = vector.broadcast %2 : vector<32x1xf32> to vector<32x128xf32>
    %6 = arith.mulf %5, %1 : vector<32x128xf32>
    %7 = arith.subf %0, %6 : vector<32x128xf32>
    %cst = arith.constant 1.000000e+00 : f32
    %8 = vector.broadcast %cst : f32 to vector<32x1xf32>
    %9 = arith.mulf %2, %8 : vector<32x1xf32>
    %cst_9 = arith.constant 1.000000e+00 : f32
    %10 = vector.broadcast %cst_9 : f32 to vector<32x1xf32>
    %11 = arith.addf %10, %9 : vector<32x1xf32>
    %12 = vector.broadcast %11 : vector<32x1xf32> to vector<32x128xf32>
    %13 = arith.mulf %12, %7 : vector<32x128xf32>
    %14 = arith.mulf %13, %7 : vector<32x128xf32>
    %cst_10 = arith.constant 1.000000e+00 : f32
    %15 = vector.broadcast %cst_10 : f32 to vector<32x1xf32>
    %16 = arith.subf %15, %4 : vector<32x1xf32>
    %cst_11 = arith.constant 2.000000e+00 : f32
    %17 = vector.broadcast %cst_11 : f32 to vector<32x1xf32>
    %18 = arith.mulf %17, %16 : vector<32x1xf32>
    %19 = arith.mulf %3, %3 : vector<32x128xf32>
    %20 = vector.broadcast %18 : vector<32x1xf32> to vector<32x128xf32>
    %21 = arith.mulf %20, %19 : vector<32x128xf32>
    %22 = arith.addf %14, %21 : vector<32x128xf32>
    %cst_12 = arith.constant dense<0.000000e+00> : vector<128xf32>
    %23 = vector.multi_reduction <add>, %22, %cst_12 [0] : vector<32x128xf32> to vector<128xf32>
    %24 = vector.shape_cast %23 : vector<128xf32> to vector<1x1x128xf32>
    %c0_13 = arith.constant 0 : index
    %c0_14 = arith.constant 0 : index
    %c0_15 = arith.constant 0 : index
    %25 = vector.load %arg6[%c0_13, %c0_14, %c0_15] : memref<1x1x128xf32, #tpu.memory_space<vmem>>, vector<1x1x128xf32>
    tpu.vector_store %arg6[%c0_13, %c0_14, %c0_15], %24 {strides = array<i32>} : memref<1x1x128xf32, #tpu.memory_space<vmem>>, vector<1x1x128xf32>,
    return
  }
  func.func @transform_0(%arg0: i32) -> (i32, i32) {
    %c0_i32 = arith.constant 0 : i32
    %c0_i32_0 = arith.constant 0 : i32
    return %arg0, %c0_i32 : i32, i32
  }
  func.func @transform_1(%arg0: i32) -> (i32, i32) {
    %c0_i32 = arith.constant 0 : i32
    %c0_i32_0 = arith.constant 0 : i32
    return %arg0, %c0_i32 : i32, i32
  }
  func.func @transform_2(%arg0: i32) -> (i32, i32) {
    %c0_i32 = arith.constant 0 : i32
    %c0_i32_0 = arith.constant 0 : i32
    return %arg0, %c0_i32 : i32, i32
  }
  func.func @transform_3(%arg0: i32) -> (i32, i32) {
    %c0_i32 = arith.constant 0 : i32
    %c0_i32_0 = arith.constant 0 : i32
    return %arg0, %c0_i32 : i32, i32
  }
  func.func @transform_4(%arg0: i32) -> (i32, i32) {
    %c0_i32 = arith.constant 0 : i32
    %c0_i32_0 = arith.constant 0 : i32
    return %arg0, %c0_i32 : i32, i32
  }
  func.func @transform_5(%arg0: i32) -> (i32, i32, i32) {
    %c0_i32 = arith.constant 0 : i32
    %c0_i32_0 = arith.constant 0 : i32
    %c0_i32_1 = arith.constant 0 : i32
    return %arg0, %c0_i32, %c0_i32_0 : i32, i32, i32
  }
}

</mosaic_0001>

<bundles_post_ra>
// kernel: tpu_custom_call.1
= control target key start
LH: loop header
LB: loop body
LE: loop exit
PB: predicated region body
PF: predicated region fallthrough
CT: control target
= control target key end

     0   :  { %10 = vsyncpa [#allocation3], 0  ;;  %s945_s0 = inlined_call_operand.vmem [shape: f32[64,128], index: 0, kind: input, shape index: {}]   ;;  %s946_s1 = inlined_call_operand.vmem [shape: f32[64,128], index: 1, kind: input, shape index: {}]   ;;  %s947_s2 = inlined_call_operand.vmem [shape: f32[64,1], index: 2, kind: input, shape index: {}]   ;;  %s948_s3 = inlined_call_operand.hbm [shape: f32[64,128], index: 3, kind: input, shape index: {}]   ;;  %s949_s4 = inlined_call_operand.vmem [shape: f32[64,1], index: 4, kind: input, shape index: {}]   ;;  %s950_s5 = inlined_call_operand.hbm [shape: f32[2,1,128], index: 5, kind: output, shape index: {}]  }
   0x1   :  { %12 = vsyncpa [#allocation3 + $0x1], 0 }
   0x2   :  { %13 = vsyncpa [#allocation4], 0 }
   0x3   :  { %15 = vsyncpa [#allocation4 + $0x1], 0  ;;  %s792_s18 = smov 0   ;;  %s794_s19 = smov 0  }
   0x4   :  { %s796_s20 = smov 0   ;;  %s798_s21 = smov 0  }
   0x5 LB: > { %s813_s22 = sadd.s32 4294967295, %s757_s21   ;;  %s590_s23 = sadd.s32 4294967294, %s757_s21   ;;  %s757_s21 = sphi %s798_s21, %s960_s21   ;;  %s753_s20 = sphi %s796_s20, %s959_s20   ;;  %s749_s19 = sphi %s794_s19, %s958_s19   ;;  %s745_s18 = sphi %s792_s18, %s957_s18  }
   0x6   : > { %s817_s24 = sadd.s32 1, %s757_s21   ;;  %s106_s25 = sadd.s32 1, %s753_s20 }
   0x7   : > { %s103_s26 = ssub.s32 %s757_s21, %s817_s24  ;;  %p113_p0 = scmp.ne.s32.totalorder %s753_s20, %s749_s19 }
   0x8   : > { %p104_p1 = scmp.eq.s32.totalorder %s103_s26, 0  ;;  %p114_p2 = scmp.eq.s32.totalorder %s757_s21, 0 }
   0x9   : > { %p119_p3 = scmp.ne.s32.totalorder %s749_s19, %s745_s18  ;;  %p120_p4 = scmp.eq.s32.totalorder %s813_s22, 0 }
   0xa   : > { %s829_s27 = scalar_select %p104_p1, %s753_s20, %s106_s25  }
   0xb   : > { %p831_p5 = por %p114_p2, %p113_p0  ;;  %p835_p6 = por %p120_p4, %p119_p3 }
   0xc   : > { %p169_p7 = scmp.eq.s32.totalorder %s813_s22, 1  ;;  %p175_p8 = scmp.eq.s32.totalorder %s590_s23, 1 }
   0xd   : > { %p621_p10 = scmp.lt.s32.totalorder %s757_s21, 2  ;;  %s222_s7 = sand.u32 1, %s753_s20  }
   0xe   : > { %p842_p11 = por %p169_p7, %p113_p0  ;;  %p846_p12 = por %p175_p8, %p119_p3 }
   0xf   : > { %s608_s8 = sshll.u32 %s757_s21, 5  ;;  %s593_s9 = sshll.u32 %s222_s7, 5 }
  0x10   : > { %s231_s12 = scalar_lea.hbm %s948_s3, %s608_s8  ;;  %s226_s14 = scalar_lea.vmem [#allocation2], %s593_s9 }
  0x11   : > { %s232_s13 = sshll.u32 %s231_s12, 4  ;;  %s234_s15 = sshll.u32 %s226_s14, 4  ;;  %s233_s13 = int_to_ptr.hbm [resolvable:$true] %s232_s13  ;;  %s235_s15 = int_to_ptr.vmem [resolvable:$true] %s234_s15 }
  0x12   : > { %p857_p13 = pnand %p621_p10, %p831_p5  ;;  %p596_p0 = scmp.ge.s32.totalorder %s757_s21, 1 }
  0x13   : > { %p251_p1 = scmp.lt.s32.totalorder %s757_s21, 3  ;;  %s223_s17 = scalar_lea.sflag [#allocation3], %s222_s7 }
  0x14   : > { %s661_s23 = sshra.s32 %s233_s13, 4  ;;  %p665_p3 = pneg %p857_p13  ;;  %s662_s23 = int_to_ptr.hbm [resolvable:$true] %s661_s23 }
  0x15   : > { %s663_s25 = scalar_lea.hbm %s662_s23, 32  ;;  %s668_s28 = scalar_lea.hbm %s948_s3, 64 }
  0x16   : > { %p664_p2 = scmp.ne.s32.totalorder %s662_s23, %s663_s25  ;;  %p669_p5 = scmp.lt.s32.totalorder %s662_s23, %s948_s3 }
  0x17   : > { %p670_p8 = scmp.lt.s32.totalorder %s668_s28, %s663_s25 }
  0x18   : > { %p666_p4 = pnand %p665_p3, %p664_p2 }
  0x19   : > { %p671_p10 = por %p670_p8, %p669_p5 }
  0x1a   : > { %p667_p7 = pneg %p666_p4 }
  0x1c   : > { %p672_p9 = pnand %p671_p10, %p667_p7 }
  0x1e   : > { %675 = shalt.err (!%p672_p9)
}
  0x1f   : > { %s759_s7 = smov 128   ;;  %s760_s11 = smov 8  }
  0x20   : > { %616 = dma.hbm_to_vmem [thread:$0]  (!%p857_p13), %s233_s13, 512, %s235_s15, %s223_s17, %s759_s7, %s759_s7, %s760_s11  }
  0x21   : > { %p252_p2 = pnand %p596_p0, %p251_p1 }
  0x22   : > { %s878_s12 = sand.u32 (!%p252_p2), 1, %s749_s19  }
  0x23   : > { %255 = sbr.rel (%p252_p2) target bundleno = 210 (0xd2), region = 40  ;;  %s597_s14 = sshll.u32 (!%p252_p2), %s878_s12, 5 }
  0x24   : > { %s258_s23 = scalar_lea.sflag (!%p252_p2), [#allocation3], %s878_s12  ;;  %s882_s25 = scalar_lea.vmem (!%p252_p2), [#allocation2], %s597_s14 }
  0x28   : > { %736 = dma.done.wait (%p835_p6), %s258_s23, 512  }
  0x29   : > { %738 = vsyncadd (%p835_p6), %s258_s23, 4294966784  ;;  %s598_s13 = sshll.u32 %s813_s22, 2  ;;  %v761_v0 = vmov 0   ;;  %v345_v34 = vld [vmem:[%s882_s25] sm:$0xff]  ;;  %v346_v40 = vld [vmem:[%s882_s25 + $0x8] sm:$0xff]  ;;  %s307_s16 = scalar_lea.vmem [#allocation5], %s878_s12 }
  0x2a   : > { %659 = vset.pattern.permute.xlu1 %v761_v0  ;;  %658 = vset.pattern.permute.xlu0 %v761_v0  ;;  %p309_p9 = scmp.lt.s32.totalorder %s598_s13, 7  ;;  %v421_v39 = vmul.f32 %v345_v34, %v345_v34  ;;  %v347_v47 = vld [vmem:[%s882_s25 + $0x10] sm:$0xff]  ;;  %v422_v48 = vmul.f32 %v346_v40, %v346_v40  ;;  %v348_v52 = vld [vmem:[%s882_s25 + $0x18] sm:$0xff]  ;;  %s474_s17 = sshll.u32 %s307_s16, 4  ;;  %s475_s17 = int_to_ptr.vmem [resolvable:$true] %s474_s17 }
  0x2b   : > { %660 = vset.pattern.permute.xlu2 %v761_v0  ;;  %v423_v57 = vmul.f32 %v347_v47, %v347_v47  ;;  %v424_v59 = vmul.f32 %v348_v52, %v348_v52  ;;  %s464_s29 = scalar_lea.sflag [#allocation4], %s878_s12 }
  0x2c   : > { %s962_s13 = smov (!%p309_p9, %s598_s13), 7 }
  0x2d   : > { %s889_s15 = sshll.u32 %s962_s13, 3 }
  0x2e   : > { %s324_s26 = scalar_lea.vmem %s947_s2, %s889_s15  ;;  %s331_s28 = scalar_lea.vmem %s949_s4, %s889_s15 }
  0x2f   : > { %v343_v1 = vld [vmem:[%s324_s26 + $0x10] sm:$0xff]  ;;  %v341_v2 = vld [vmem:[%s324_s26] sm:$0xff]  ;;  %v342_v4 = vld [vmem:[%s324_s26 + $0x8] sm:$0xff]  ;;  %s318_s7 = scalar_lea.vmem %s946_s1, %s889_s15  ;;  %s312_s23 = scalar_lea.vmem %s945_s0, %s889_s15 }
  0x30   : > { %365 = vperm.xlu1 %659, %v343_v1   ;;  %355 = vperm.xlu0 %658, %v341_v2   ;;  %v381_v3 = vadd.f32 1.0, %v341_v2  ;;  %v344_v5 = vld [vmem:[%s324_s26 + $0x18] sm:$0xff]  ;;  %v349_v6 = vld [vmem:[%s331_s28] sm:$0xff]  ;;  %v382_v7 = vadd.f32 1.0, %v342_v4  ;;  %v350_v8 = vld [vmem:[%s331_s28 + $0x8] sm:$0xff]  ;;  %v383_v11 = vadd.f32 1.0, %v343_v1  ;;  %s472_s15 = scalar_lea.hbm %s950_s5, %s813_s22 }
  0x31   : > { %v413_v9 = vsub.f32 1.0, %v349_v6  ;;  %v414_v10 = vsub.f32 1.0, %v350_v8  ;;  %v351_v13 = vld [vmem:[%s331_s28 + $0x10] sm:$0xff]  ;;  %v352_v15 = vld [vmem:[%s331_s28 + $0x18] sm:$0xff]  ;;  %v384_v18 = vadd.f32 1.0, %v344_v5  ;;  %v337_v25 = vld [vmem:[%s318_s7] sm:$0xff] }
  0x32   : > { %387 = vperm.xlu2 %660, %v381_v3   ;;  %v415_v16 = vsub.f32 1.0, %v351_v13  ;;  %v416_v17 = vsub.f32 1.0, %v352_v15  ;;  %v338_v26 = vld [vmem:[%s318_s7 + $0x8] sm:$0xff]  ;;  %v333_v31 = vld [vmem:[%s312_s23] sm:$0xff]  ;;  %v339_v33 = vld [vmem:[%s318_s7 + $0x10] sm:$0xff]  ;;  %s476_s26 = sshll.u32 %s472_s15, 4  ;;  %s477_s26 = int_to_ptr.hbm [resolvable:$true] %s476_s26 }
  0x33   : > { %v417_v12 = vmul.f32 2.0, %v413_v9  ;;  %v418_v14 = vmul.f32 2.0, %v414_v10  ;;  %v334_v32 = vld [vmem:[%s312_s23 + $0x8] sm:$0xff]  ;;  %v340_v41 = vld [vmem:[%s318_s7 + $0x18] sm:$0xff]  ;;  %v335_v44 = vld [vmem:[%s312_s23 + $0x10] sm:$0xff]  ;;  %s705_s8 = sshra.s32 %s477_s26, 4  ;;  %s706_s8 = int_to_ptr.hbm [resolvable:$true] %s705_s8 }
  0x34   : > { %v419_v19 = vmul.f32 2.0, %v415_v16  ;;  %v420_v20 = vmul.f32 2.0, %v416_v17  ;;  %v336_v53 = vld [vmem:[%s312_s23 + $0x18] sm:$0xff]  ;;  %s707_s28 = scalar_lea.hbm %s706_s8, 1  ;;  %s711_s22 = scalar_lea.hbm %s950_s5, 2 }
  0x35   : > { %p708_p6 = scmp.ne.s32.totalorder %s706_s8, %s707_s28  ;;  %p712_p1 = scmp.lt.s32.totalorder %s706_s8, %s950_s5 }
  0x36   : > { %p713_p3 = scmp.lt.s32.totalorder %s711_s22, %s707_s28 }
  0x37   : > { %p709_p13 = pnand %p708_p6, %p842_p11 }
  0x38   : > { %370 = vperm.xlu1 %659, %v344_v5   ;;  %360 = vperm.xlu0 %658, %v342_v4   ;;  %p714_p4 = por %p713_p3, %p712_p1 }
  0x39   : > { %p710_p0 = pneg %p709_p13 }
  0x3a   : > { %392 = vperm.xlu2 %660, %v382_v7  }
  0x3b   : > { %p715_p7 = pnand %p714_p4, %p710_p0 }
  0x40   : > { %427 = vperm.xlu1 %659, %v417_v12   ;;  %397 = vperm.xlu0 %658, %v383_v11  }
  0x42   : > { %432 = vperm.xlu2 %660, %v418_v14  }
  0x48   : > { %437 = vperm.xlu1 %659, %v419_v19   ;;  %402 = vperm.xlu0 %658, %v384_v18  }
  0x4a   : > { %442 = vperm.xlu2 %660, %v420_v20  }
  0x8c   : > { %v388_v21 = vpop.permute.xlu2 %387 }
  0x94   : > { %v393_v24 = vpop.permute.xlu2 %392 }
  0x9c   : > { %v433_v35 = vpop.permute.xlu2 %432 }
  0x9d   : > { %v446_v58 = vmul.f32 %v433_v35, %v422_v48 }
  0xa2   : > { %v366_v22 = vpop.permute.xlu1 %365  ;;  %v356_v23 = vpop.permute.xlu0 %355 }
  0xa3   : > { %v373_v29 = vmul.f32 %v356_v23, %v337_v25  ;;  %v375_v38 = vmul.f32 %v366_v22, %v339_v33 }
  0xa4   : > { %v443_v60 = vpop.permute.xlu2 %442 }
  0xa5   : > { %v377_v36 = vsub.f32 %v333_v31, %v373_v29  ;;  %v379_v51 = vsub.f32 %v335_v44, %v375_v38  ;;  %v448_v5 = vmul.f32 %v443_v60, %v424_v59 }
  0xa7   : > { %v405_v45 = vmul.f32 %v388_v21, %v377_v36 }
  0xa9   : > { %v409_v55 = vmul.f32 %v405_v45, %v377_v36 }
  0xaa   : > { %v371_v27 = vpop.permute.xlu1 %370  ;;  %v361_v28 = vpop.permute.xlu0 %360 }
  0xab   : > { %v374_v30 = vmul.f32 %v361_v28, %v338_v26  ;;  %v376_v49 = vmul.f32 %v371_v27, %v340_v41 }
  0xad   : > { %v378_v37 = vsub.f32 %v334_v32, %v374_v30  ;;  %v380_v62 = vsub.f32 %v336_v53, %v376_v49 }
  0xaf   : > { %v406_v46 = vmul.f32 %v393_v24, %v378_v37 }
  0xb1   : > { %v410_v54 = vmul.f32 %v406_v46, %v378_v37 }
  0xb2   : > { %v428_v42 = vpop.permute.xlu1 %427  ;;  %v398_v43 = vpop.permute.xlu0 %397 }
  0xb3   : > { %v445_v50 = vmul.f32 %v428_v42, %v421_v39  ;;  %v407_v56 = vmul.f32 %v398_v43, %v379_v51  ;;  %v450_v1 = vadd.f32 %v446_v58, %v410_v54 }
  0xb5   : > { %v449_v61 = vadd.f32 %v445_v50, %v409_v55  ;;  %v411_v2 = vmul.f32 %v407_v56, %v379_v51 }
  0xb7   : > { %v453_v6 = vadd.f32 %v450_v1, %v449_v61 }
  0xba   : > { %v438_v63 = vpop.permute.xlu1 %437  ;;  %v403_v0 = vpop.permute.xlu0 %402 }
  0xbb   : > { %v447_v3 = vmul.f32 %v438_v63, %v423_v57  ;;  %v408_v4 = vmul.f32 %v403_v0, %v380_v62 }
  0xbd   : > { %v451_v7 = vadd.f32 %v447_v3, %v411_v2  ;;  %v412_v8 = vmul.f32 %v408_v4, %v380_v62 }
  0xbf   : > { %v454_v9 = vadd.f32 %v453_v6, %v451_v7  ;;  %v452_v10 = vadd.f32 %v448_v5, %v412_v8 }
  0xc1   : > { %v455_v11 = vadd.f32 %v454_v9, %v452_v10 }
  0xc3   : > { %v456_v12 = vrot.slane %v455_v11, 4 }
  0xc5   : > { %v457_v13 = vadd.f32 %v456_v12, %v455_v11 }
  0xc7   : > { %v458_v14 = vrot.slane %v457_v13, 2 }
  0xc9   : > { %v459_v15 = vadd.f32 %v458_v14, %v457_v13 }
  0xcb   : > { %v460_v16 = vrot.slane %v459_v15, 1 }
  0xcd   : > { %v461_v17 = vadd.f32 %v460_v16, %v459_v15 }
  0xcf   : > { %462 = vst [vmem:[%s307_s16] sm:$0x1] %v461_v17 }
  0xd0   : > { %718 = shalt.err (!%p715_p7)
}
  0xd1   : > { %611 = dma.vmem_to_hbm [thread:$0]  (%p842_p11), %s475_s17, 16, %s477_s26, %s464_s29  }
  0xd2 PF: > { %s488_s12 = sand.u32 1, %s745_s18   ;;  %p956_p5 = scmp.ge.s32.totalorder %s757_s21, 2 }
  0xd3   : > { %s489_s14 = scalar_lea.sflag [#allocation4], %s488_s12 }
  0xd4   : > { %p618_p8 = pnand %p956_p5, %p846_p12 }
  0xd6   : > { %p619_p10 = pneg %p618_p8 }
  0xd8   : > { %740 = dma.done.wait (%p619_p10), %s489_s14, 16  }
  0xd9   : > { %742 = vsyncadd (%p619_p10), %s489_s14, 4294967280  ;;  %p18_p2 = scmp.ge.s32.totalorder %s817_s24, 4   ;;  %s957_s18 = smov %s749_s19 }
  0xda   : > { %s958_s19 = smov %s753_s20  ;;  %s959_s20 = smov %s829_s27 }
  0xdb   : > { %s960_s21 = smov %s817_s24  ;;  %20 = sbr.rel (!%p18_p2) target bundleno = 5 (0x5), region = 97 }
  0xe0   :  { %494 = vsyncpa [#allocation3], 1 }
  0xe1   :  { %496 = vsyncpa [#allocation3 + $0x1], 1 }
  0xe2   :  { %497 = vsyncpa [#allocation4], 1 }
  0xe3   :  { %499 = vsyncpa [#allocation4 + $0x1], 1 }

</bundles_post_ra>
